<compile_context>
chip_gen: v5e
topology: v5e:2x2
jax: 0.10.0
libtpu: 0.0.40
codegen_flags: <defaults>
</compile_context>

<pallas_src>
import functools

import jax
import jax.numpy as jnp
from jax.experimental import pallas as pl
from jax.experimental.pallas import tpu as pltpu


def _bn_kernel(x_ref, gamma_ref, beta_ref, o_ref, mean_ref, var_ref,
               *, eps, n_rows):
    # x block: (bs, TILE_C, sz) in the tensor's native NCL layout.  One fused
    # minor-dim swap to channel-last; everything downstream is lane-aligned.
    xt = jnp.swapaxes(x_ref[...], 1, 2)                     # (bs, sz, TILE_C)

    inv_n = 1.0 / n_rows
    inv_nm1 = 1.0 / (n_rows - 1.0)

    def col_sum_f32(a):
        # (bs, sz, TILE_C) -> (1, TILE_C) with f32 accumulation.  The axis-0
        # fold is plain VPU adds across vregs; the final fold is a cheap
        # sublane reduction.  No cross-lane (XLU) reduction is needed.
        s = jnp.sum(a, axis=0, dtype=jnp.float32)           # (sz, TILE_C)
        return jnp.sum(s, axis=0, keepdims=True)            # (1, TILE_C)

    mean = col_sum_f32(xt) * inv_n                          # (1, TILE_C) f32

    if xt.dtype == jnp.float32:
        # Two-pass (stable) unbiased variance.
        diff = xt - mean
        var = col_sum_f32(diff * diff) * inv_nm1            # (1, TILE_C) f32
    else:
        # One-pass sum / sum-of-squares with f32 accumulation; avoids
        # materializing a full-block f32 copy of x for sub-f32 inputs.
        # TODO(synk): per-element squares are computed in the input dtype
        # (e.g. bf16) before the f32 accumulate; fine for activations.
        ex2 = col_sum_f32(xt * xt) * inv_n
        var = (ex2 - mean * mean) * (n_rows * inv_nm1)

    gamma = gamma_ref[...].astype(jnp.float32)              # (1, TILE_C)
    beta = beta_ref[...].astype(jnp.float32)                # (1, TILE_C)
    # Reference semantics: divide by (var + eps) -- NO sqrt (faithful to the
    # module; do not "fix" to rsqrt).  Folded into per-channel scale/shift so
    # per-element work is one mul + one add and `diff` is not live at store.
    scale = gamma / (var + eps)                             # (1, TILE_C)
    shift = beta - mean * scale                             # (1, TILE_C)

    if xt.dtype == jnp.float32:
        y = xt * scale + shift
    else:
        y = xt * scale.astype(xt.dtype) + shift.astype(xt.dtype)

    # Output block is already channel-last (bs, sz, TILE_C): direct store,
    # no output-side transpose, lane-dense.
    o_ref[...] = y.astype(o_ref.dtype)
    mean_ref[...] = mean
    var_ref[...] = var


def _vmem_budget_and_limit():
    # Generation-aware sizing: ~70% of per-core VMEM as the tiling budget and
    # ~85% as the explicit compiler limit (v5e/v6e: 128 MiB -> ~90 / 109 MiB;
    # v7x: 64 MiB per core -> ~45 / 54 MiB).
    cap = 64 * 1024 * 1024
    try:
        cap = int(pltpu.get_tpu_info().vmem_capacity_bytes)
    except Exception:
        pass
    return int(cap * 0.70), int(cap * 0.85)


def _choose_tile_c(c, n_rows, in_itemsize, out_itemsize, budget_bytes):
    # Per-channel VMEM per grid step: double-buffered input + output blocks
    # plus ~2 live full-block work temporaries (the channel-last transpose of
    # x and diff/y) at f32 width.
    per_channel = n_rows * (2 * in_itemsize + 2 * out_itemsize + 2 * 4)
    max_c = max(1, int(budget_bytes // per_channel))

    if c <= 128:
        # TILE_C must be a multiple of 128 or the full channel dim (it is the
        # second-minor dim of the input block and the minor dim of the output
        # / gamma / beta / stat blocks); for small c the full dim is the only
        # legal choice.
        return c

    if c <= max_c:
        # The whole channel range fits in one block, but still split it into
        # >= 2 128-aligned tiles so dimension_semantics=("parallel",) can
        # shard the grid across both TensorCores on v7x (one extra grid step
        # is noise on v5e/v6e).
        half = ((pl.cdiv(c, 2) + 127) // 128) * 128
        return half if half < c else c

    tile = (max_c // 128) * 128
    if tile < 128:
        # TODO(synk): bs*sz so large that even a 128-channel tile exceeds the
        # VMEM budget; a robust fix needs a second grid axis over bs/sz with
        # two-phase stats.  Fall back to 128 and rely on vmem_limit headroom.
        tile = 128
    return min(tile, c)


def custom_batchnorm1d_forward(x, gamma, beta, r_mean, r_var,
                               momentum=0.1, eps=1e-8):
    """Training-mode forward of Custom_Batchnorm1D.

    x: (bs, c, sz)  ->  returns (out, new_r_mean, new_r_var)
    out has shape (bs*sz, c), matching the PyTorch module's return value.
    """
    bs, c, sz = x.shape
    n = bs * sz
    assert n > 1, "unbiased variance needs at least 2 rows"

    budget, vmem_limit = _vmem_budget_and_limit()
    tile_c = _choose_tile_c(c, n, x.dtype.itemsize, x.dtype.itemsize, budget)
    grid = (pl.cdiv(c, tile_c),)

    out3, mean, var = pl.pallas_call(
        functools.partial(_bn_kernel, eps=float(eps), n_rows=float(n)),
        grid=grid,
        out_shape=(
            jax.ShapeDtypeStruct((bs, sz, c), x.dtype),     # normalized out (NLC)
            jax.ShapeDtypeStruct((1, c), jnp.float32),      # batch mean
            jax.ShapeDtypeStruct((1, c), jnp.float32),      # batch var (unbiased)
        ),
        in_specs=[
            pl.BlockSpec((bs, tile_c, sz), lambda j: (0, j, 0)),   # x (native NCL)
            pl.BlockSpec((1, tile_c), lambda j: (0, j)),           # gamma (lane-dense)
            pl.BlockSpec((1, tile_c), lambda j: (0, j)),           # beta  (lane-dense)
        ],
        out_specs=(
            pl.BlockSpec((bs, sz, tile_c), lambda j: (0, 0, j)),   # out (NLC)
            pl.BlockSpec((1, tile_c), lambda j: (0, j)),
            pl.BlockSpec((1, tile_c), lambda j: (0, j)),
        ),
        compiler_params=pltpu.CompilerParams(
            dimension_semantics=("parallel",),
            vmem_limit_bytes=vmem_limit,
        ),
    )(x, gamma.reshape(1, c), beta.reshape(1, c))

    # (bs, sz, c) -> (bs*sz, c) is a free view (no copy).
    out = out3.reshape(n, c)

    # Buffer side-effect of the module (plain-JAX glue on per-channel stats).
    mean = mean.reshape(c)
    var = var.reshape(c)
    new_r_mean = (1.0 - momentum) * r_mean + momentum * mean
    new_r_var = (1.0 - momentum) * r_var + momentum * var
    return out, new_r_mean, new_r_var


def _reference_forward(x, gamma, beta, eps=1e-8):
    bs, c, sz = x.shape
    out = jnp.transpose(x, (0, 2, 1)).reshape(-1, c)
    mean = jnp.mean(out, axis=0)
    var = jnp.var(out, axis=0, ddof=1)
    out = (out - mean) / (var + eps)      # NOTE: no sqrt -- module semantics
    return out * gamma + beta, mean, var


if __name__ == "__main__":
    key = jax.random.PRNGKey(0)
    k_x, k_gamma = jax.random.split(key)

    bs, c, sz = 2, 4, 16
    x = jax.random.normal(k_x, (bs, c, sz), dtype=jnp.float32)

    # Deterministic parameter init mirroring init_param():
    #   gamma ~ U(0, 1), beta = 0, r_mean = 0, r_var = 1
    gamma = jax.random.uniform(k_gamma, (c,), dtype=jnp.float32)
    beta = jnp.zeros((c,), dtype=jnp.float32)
    r_mean = jnp.zeros((c,), dtype=jnp.float32)
    r_var = jnp.ones((c,), dtype=jnp.float32)

    momentum = 0.1
    eps = 1e-8
    out, new_r_mean, new_r_var = custom_batchnorm1d_forward(
        x, gamma, beta, r_mean, r_var, momentum=momentum, eps=eps)
    out = jax.block_until_ready(out)
    jax.block_until_ready(new_r_mean)
    jax.block_until_ready(new_r_var)

    ref_out, ref_mean, ref_var = _reference_forward(x, gamma, beta, eps=eps)
    ref_r_mean = (1.0 - momentum) * r_mean + momentum * ref_mean
    ref_r_var = (1.0 - momentum) * r_var + momentum * ref_var

    assert out.shape == (bs * sz, c)
    assert jnp.allclose(out, ref_out, atol=1e-4, rtol=1e-4)
    assert jnp.allclose(new_r_mean, ref_r_mean, atol=1e-5, rtol=1e-5)
    assert jnp.allclose(new_r_var, ref_r_var, atol=1e-5, rtol=1e-5)

    print("KERNEL_OK")
</pallas_src>

<mosaic_0001>
module attributes {stable_mosaic.version = 11 : i64} {
  func.func @_bn_kernel(%arg0: i32, %arg1: memref<2x4x16xf32, #tpu.memory_space<vmem>>, %arg2: memref<1x4xf32, #tpu.memory_space<vmem>>, %arg3: memref<1x4xf32, #tpu.memory_space<vmem>>, %arg4: memref<2x16x4xf32, #tpu.memory_space<vmem>>, %arg5: memref<1x4xf32, #tpu.memory_space<vmem>>, %arg6: memref<1x4xf32, #tpu.memory_space<vmem>>) attributes {dimension_semantics = [#tpu.dimension_semantics<parallel>], iteration_bounds = array<i64: 1>, scalar_prefetch = 0 : i64, scratch_operands = 0 : i64, tpu.core_type = #tpu.core_type<tc>, window_params = [{transform_indices = @transform_0, window_bounds = array<i64: 2, 4, 16>}, {transform_indices = @transform_1, window_bounds = array<i64: 1, 4>}, {transform_indices = @transform_2, window_bounds = array<i64: 1, 4>}, {transform_indices = @transform_3, window_bounds = array<i64: 2, 16, 4>}, {transform_indices = @transform_4, window_bounds = array<i64: 1, 4>}, {transform_indices = @transform_5, window_bounds = array<i64: 1, 4>}]} {
    %c0 = arith.constant 0 : index
    %c0_0 = arith.constant 0 : index
    %c0_1 = arith.constant 0 : index
    %0 = vector.load %arg1[%c0, %c0_0, %c0_1] : memref<2x4x16xf32, #tpu.memory_space<vmem>>, vector<2x4x16xf32>
    %1 = tpu.transpose %0, [0, 2, 1] : vector<2x4x16xf32> -> vector<2x16x4xf32>
    %cst = arith.constant dense<0.000000e+00> : vector<16x4xf32>
    %2 = vector.multi_reduction <add>, %1, %cst [0] : vector<2x16x4xf32> to vector<16x4xf32>
    %cst_2 = arith.constant dense<0.000000e+00> : vector<4xf32>
    %3 = vector.multi_reduction <add>, %2, %cst_2 [0] : vector<16x4xf32> to vector<4xf32>
    %4 = vector.shape_cast %3 : vector<4xf32> to vector<1x4xf32>
    %cst_3 = arith.constant 3.125000e-02 : f32
    %5 = vector.broadcast %cst_3 : f32 to vector<1x4xf32>
    %6 = arith.mulf %4, %5 : vector<1x4xf32>
    %7 = vector.shape_cast %6 : vector<1x4xf32> to vector<1x1x4xf32>
    %8 = vector.broadcast %7 : vector<1x1x4xf32> to vector<2x16x4xf32>
    %9 = arith.subf %1, %8 : vector<2x16x4xf32>
    %10 = arith.mulf %9, %9 : vector<2x16x4xf32>
    %cst_4 = arith.constant dense<0.000000e+00> : vector<16x4xf32>
    %11 = vector.multi_reduction <add>, %10, %cst_4 [0] : vector<2x16x4xf32> to vector<16x4xf32>
    %cst_5 = arith.constant dense<0.000000e+00> : vector<4xf32>
    %12 = vector.multi_reduction <add>, %11, %cst_5 [0] : vector<16x4xf32> to vector<4xf32>
    %13 = vector.shape_cast %12 : vector<4xf32> to vector<1x4xf32>
    %cst_6 = arith.constant 0.0322580636 : f32
    %14 = vector.broadcast %cst_6 : f32 to vector<1x4xf32>
    %15 = arith.mulf %13, %14 : vector<1x4xf32>
    %c0_7 = arith.constant 0 : index
    %c0_8 = arith.constant 0 : index
    %16 = vector.load %arg2[%c0_7, %c0_8] : memref<1x4xf32, #tpu.memory_space<vmem>>, vector<1x4xf32>
    %c0_9 = arith.constant 0 : index
    %c0_10 = arith.constant 0 : index
    %17 = vector.load %arg3[%c0_9, %c0_10] : memref<1x4xf32, #tpu.memory_space<vmem>>, vector<1x4xf32>
    %cst_11 = arith.constant 9.99999993E-9 : f32
    %18 = vector.broadcast %cst_11 : f32 to vector<1x4xf32>
    %19 = arith.addf %15, %18 : vector<1x4xf32>
    %20 = arith.divf %16, %19 : vector<1x4xf32>
    %21 = arith.mulf %6, %20 : vector<1x4xf32>
    %22 = arith.subf %17, %21 : vector<1x4xf32>
    %23 = vector.shape_cast %20 : vector<1x4xf32> to vector<1x1x4xf32>
    %24 = vector.broadcast %23 : vector<1x1x4xf32> to vector<2x16x4xf32>
    %25 = arith.mulf %1, %24 : vector<2x16x4xf32>
    %26 = vector.shape_cast %22 : vector<1x4xf32> to vector<1x1x4xf32>
    %27 = vector.broadcast %26 : vector<1x1x4xf32> to vector<2x16x4xf32>
    %28 = arith.addf %25, %27 : vector<2x16x4xf32>
    %c0_12 = arith.constant 0 : index
    %c0_13 = arith.constant 0 : index
    %c0_14 = arith.constant 0 : index
    %29 = vector.load %arg4[%c0_12, %c0_13, %c0_14] : memref<2x16x4xf32, #tpu.memory_space<vmem>>, vector<2x16x4xf32>
    tpu.vector_store %arg4[%c0_12, %c0_13, %c0_14], %28 {strides = array<i32>} : memref<2x16x4xf32, #tpu.memory_space<vmem>>, vector<2x16x4xf32>,
    %c0_15 = arith.constant 0 : index
    %c0_16 = arith.constant 0 : index
    %30 = vector.load %arg5[%c0_15, %c0_16] : memref<1x4xf32, #tpu.memory_space<vmem>>, vector<1x4xf32>
    tpu.vector_store %arg5[%c0_15, %c0_16], %6 {strides = array<i32>} : memref<1x4xf32, #tpu.memory_space<vmem>>, vector<1x4xf32>,
    %c0_17 = arith.constant 0 : index
    %c0_18 = arith.constant 0 : index
    %31 = vector.load %arg6[%c0_17, %c0_18] : memref<1x4xf32, #tpu.memory_space<vmem>>, vector<1x4xf32>
    tpu.vector_store %arg6[%c0_17, %c0_18], %15 {strides = array<i32>} : memref<1x4xf32, #tpu.memory_space<vmem>>, vector<1x4xf32>,
    return
  }
  func.func @transform_0(%arg0: i32) -> (i32, i32, i32) {
    %c0_i32 = arith.constant 0 : i32
    %c0_i32_0 = arith.constant 0 : i32
    %c0_i32_1 = arith.constant 0 : i32
    return %c0_i32, %arg0, %c0_i32_0 : i32, i32, i32
  }
  func.func @transform_1(%arg0: i32) -> (i32, i32) {
    %c0_i32 = arith.constant 0 : i32
    %c0_i32_0 = arith.constant 0 : i32
    return %c0_i32, %arg0 : i32, i32
  }
  func.func @transform_2(%arg0: i32) -> (i32, i32) {
    %c0_i32 = arith.constant 0 : i32
    %c0_i32_0 = arith.constant 0 : i32
    return %c0_i32, %arg0 : i32, i32
  }
  func.func @transform_3(%arg0: i32) -> (i32, i32, i32) {
    %c0_i32 = arith.constant 0 : i32
    %c0_i32_0 = arith.constant 0 : i32
    %c0_i32_1 = arith.constant 0 : i32
    return %c0_i32, %c0_i32_0, %arg0 : i32, i32, i32
  }
  func.func @transform_4(%arg0: i32) -> (i32, i32) {
    %c0_i32 = arith.constant 0 : i32
    %c0_i32_0 = arith.constant 0 : i32
    return %c0_i32, %arg0 : i32, i32
  }
  func.func @transform_5(%arg0: i32) -> (i32, i32) {
    %c0_i32 = arith.constant 0 : i32
    %c0_i32_0 = arith.constant 0 : i32
    return %c0_i32, %arg0 : i32, i32
  }
}

</mosaic_0001>

<bundles_post_ra>
// kernel: tpu_custom_call.1
= control target key start
LH: loop header
LB: loop body
LE: loop exit
PB: predicated region body
PF: predicated region fallthrough
CT: control target
= control target key end

     0   :  { %11 = vsyncpa [#allocation3], 0  ;;  %s449_s0 = inlined_call_operand.hbm [shape: f32[2,4,16], index: 0, kind: input, shape index: {}]   ;;  %s450_s1 = inlined_call_operand.hbm [shape: f32[1,4], index: 1, kind: input, shape index: {}]   ;;  %s451_s2 = inlined_call_operand.vmem [shape: f32[1,4], index: 2, kind: input, shape index: {}]   ;;  %s452_s3 = inlined_call_operand.vmem [shape: f32[2,16,4], index: 3, kind: output, shape index: {0}]   ;;  %s453_s4 = inlined_call_operand.hbm [shape: f32[1,4], index: 4, kind: output, shape index: {1}]   ;;  %s454_s5 = inlined_call_operand.hbm [shape: f32[1,4], index: 5, kind: output, shape index: {2}]  }
   0x1   :  { %12 = vsyncpa [#allocation6], 0 }
   0x2   :  { %13 = vsyncpa [#allocation4], 0 }
   0x3   :  { %14 = vsyncpa [#allocation9], 0  ;;  %s19_s20 = sshll.u32 %s449_s0, 4  ;;  %s348_s21 = smov [#allocation2]   ;;  %s20_s20 = int_to_ptr.hbm [resolvable:$true] %s19_s20 }
   0x4   :  { %s21_s22 = sshll.u32 %s348_s21, 4  ;;  %s33_s25 = sshll.u32 %s450_s1, 4  ;;  %s22_s22 = int_to_ptr.vmem [resolvable:$true] %s21_s22  ;;  %s34_s25 = int_to_ptr.hbm [resolvable:$true] %s33_s25 }
   0x5   :  { %s349_s26 = smov 64   ;;  %s350_s27 = smov 4  }
   0x6   :  { %27 = dma.hbm_to_vmem [thread:$0]  %s20_s20, 128, %s22_s22, [#allocation3], %s349_s26, %s349_s26, %s350_s27  }
   0x7   :  { %s351_s28 = smov [#allocation5]  }
   0x8   :  { %s35_s29 = sshll.u32 %s351_s28, 4  ;;  %s36_s29 = int_to_ptr.vmem [resolvable:$true] %s35_s29 }
   0x9   :  { %38 = dma.hbm_to_vmem [thread:$0]  %s34_s25, 16, %s36_s29, [#allocation6]  }
   0xa   :  { %340 = dma.done.wait [#allocation3], 128  }
   0xb   :  { %341 = vsyncadd [#allocation3], 4294967168 }
   0xc   :  { %342 = dma.done.wait [#allocation6], 16  }
   0xd   :  { %343 = vsyncadd [#allocation6], 4294967280  ;;  %v49_v0 = vld [vmem:[#allocation2] sm:$0xf]  ;;  %v50_v1 = vld [vmem:[#allocation2 + $0x4] sm:$0xf] }
   0xe   :  { %51 = vxpose.xlu0.b32.start.end [1/1] (short) (narrow) %v49_v0, 16  ;;  %vm115_vm0 = vcmask 31744   ;;  %s352_s0 = smov [#allocation7]   ;;  %s206_s7 = sshll.u32 %s453_s4, 4  ;;  %vm194_vm1 = vcmask 24576   ;;  %s207_s7 = int_to_ptr.hbm [resolvable:$true] %s206_s7 }
   0xf   :  { %s204_s1 = sshll.u32 %s352_s0, 4  ;;  %s353_s4 = smov [#allocation8]   ;;  %v156_v54 = vld [vmem:[#allocation5] sm:$0x1]  ;;  %v157_v59 = vld [vmem:[%s451_s2] sm:$0x1]  ;;  %s205_s1 = int_to_ptr.vmem [resolvable:$true] %s204_s1 }
  0x10   :  { %s215_s8 = sshll.u32 %s353_s4, 4  ;;  %s217_s11 = sshll.u32 %s454_s5, 4  ;;  %s216_s8 = int_to_ptr.vmem [resolvable:$true] %s215_s8  ;;  %s218_s11 = int_to_ptr.hbm [resolvable:$true] %s217_s11 }
  0x1e   :  { %83 = vxpose.xlu0.b32.start.end [1/1] (short) (narrow) %v50_v1, 16 }
  0xb2   :  { %v390_v2 = vpop.trf.xlu0 }
  0xb3   :  { %v116_v6 = vsel %vm115_vm0, %v390_v2, 0.0 }
  0xba   :  { %v392_v3 = vpop.trf.xlu0 }
  0xbb   :  { %v119_v9 = vsel %vm115_vm0, %v392_v3, 0.0 }
  0xc2   :  { %v394_v4 = vpop.trf.xlu0 }
  0xc3   :  { %v117_v5 = vsel %vm115_vm0, %v394_v4, 0.0 }
  0xc4   :  { %v118_v7 = vadd.f32 %v117_v5, %v116_v6 }
  0xc6   :  { %v122_v12 = vsel %vm115_vm0, %v118_v7, 0.0 }
  0xca   :  { %v400_v8 = vpop.trf.xlu0 }
  0xcb   :  { %v120_v10 = vsel %vm115_vm0, %v400_v8, 0.0 }
  0xcc   :  { %v121_v11 = vadd.f32 %v120_v10, %v119_v9 }
  0xce   :  { %v123_v13 = vsel %vm115_vm0, %v121_v11, 0.0 }
  0xcf   :  { %v124_v14 = vadd.f32 %v123_v13, %v122_v12 }
  0xd1   :  { %v125_v15 = vrot.slane %v124_v14, 4 }
  0xd3   :  { %v126_v16 = vadd.f32 %v125_v15, %v124_v14 }
  0xd5   :  { %v127_v17 = vrot.slane %v126_v16, 2 }
  0xd7   :  { %v128_v18 = vadd.f32 %v127_v17, %v126_v16 }
  0xd9   :  { %v129_v19 = vrot.slane %v128_v18, 1 }
  0xdb   :  { %v130_v20 = vadd.f32 %v129_v19, %v128_v18 }
  0xdd   :  { %v131_v21 = vmul.f32 0.03125, %v130_v20 }
  0xdf   :  { %v132_v22 = vsub.f32 %v390_v2, %v131_v21  ;;  %v133_v23 = vsub.f32 %v392_v3, %v131_v21  ;;  %v134_v24 = vsub.f32 %v394_v4, %v131_v21  ;;  %v135_v25 = vsub.f32 %v400_v8, %v131_v21  ;;  %195 = vst.msk [vmem:[#allocation7] sm:$0x1] %vm194_vm1, %v131_v21 }
  0xe0   :  { %209 = dma.vmem_to_hbm [thread:$0]  %s205_s1, 16, %s207_s7, [#allocation4]  }
  0xe1   :  { %v136_v26 = vmul.f32 %v132_v22, %v132_v22  ;;  %v137_v27 = vmul.f32 %v133_v23, %v133_v23  ;;  %v138_v28 = vmul.f32 %v134_v24, %v134_v24  ;;  %v139_v29 = vmul.f32 %v135_v25, %v135_v25 }
  0xe3   :  { %v140_v30 = vsel %vm115_vm0, %v136_v26, 0.0  ;;  %v141_v31 = vsel %vm115_vm0, %v138_v28, 0.0  ;;  %v143_v32 = vsel %vm115_vm0, %v137_v27, 0.0  ;;  %v144_v33 = vsel %vm115_vm0, %v139_v29, 0.0 }
  0xe4   :  { %v142_v34 = vadd.f32 %v141_v31, %v140_v30  ;;  %v145_v35 = vadd.f32 %v144_v33, %v143_v32 }
  0xe6   :  { %v146_v36 = vsel %vm115_vm0, %v142_v34, 0.0  ;;  %v147_v37 = vsel %vm115_vm0, %v145_v35, 0.0 }
  0xe7   :  { %v148_v38 = vadd.f32 %v147_v37, %v146_v36 }
  0xe9   :  { %v149_v39 = vrot.slane %v148_v38, 4 }
  0xeb   :  { %v150_v40 = vadd.f32 %v149_v39, %v148_v38 }
  0xed   :  { %v151_v41 = vrot.slane %v150_v40, 2 }
  0xef   :  { %v152_v42 = vadd.f32 %v151_v41, %v150_v40 }
  0xf1   :  { %v153_v43 = vrot.slane %v152_v42, 1 }
  0xf3   :  { %v154_v44 = vadd.f32 %v153_v43, %v152_v42 }
  0xf5   :  { %v155_v45 = vmul.f32 0.032258064, %v154_v44 }
  0xf7   :  { %v158_v46 = vadd.f32 1e-08, %v155_v45  ;;  %196 = vst.msk [vmem:[#allocation8] sm:$0x1] %vm194_vm1, %v155_v45 }
  0xf8   :  { %220 = dma.vmem_to_hbm [thread:$0]  %s216_s8, 16, %s218_s11, [#allocation9]  }
  0xf9   :  { %242 = vrcp.f32 %v158_v46  ;;  %v170_v50 = vand.u32 2147483648, %v158_v46  ;;  %v168_v52 = vand.u32 2147483647, %v158_v46  ;;  %vm164_vm3 = vweird.f32 %v158_v46 }
  0xfb   :  { %v171_v55 = vor.u32 1.1754944e-38, %v170_v50  ;;  %vm169_vm5 = vcmp.eq.f32.partialorder %v168_v52, 8.507059e+37 }
  0xff   :  { %v243_v47 = vpop.eup %242 }
 0x100   :  { %v160_v48 = vmul.f32 %v243_v47, %v158_v46  ;;  %vm165_vm2 = vweird.f32 %v243_v47 }
 0x101   :  { %vm166_vm4 = vmor %vm164_vm3, %vm165_vm2 }
 0x102   :  { %v161_v49 = vsub.f32 1.0, %v160_v48 }
 0x104   :  { %v162_v51 = vmul.f32 %v243_v47, %v161_v49 }
 0x106   :  { %v163_v53 = vadd.f32 %v243_v47, %v162_v51 }
 0x108   :  { %v167_v56 = vsel %vm166_vm4, %v243_v47, %v163_v53 }
 0x109   :  { %v172_v57 = vsel %vm169_vm5, %v171_v55, %v167_v56 }
 0x10a   :  { %v173_v58 = vmul.f32 %v172_v57, %v156_v54 }
 0x10c   :  { %v174_v60 = vmul.f32 %v173_v58, %v131_v21  ;;  %v177_v61 = vperm.slane %v173_v58, 0 }
 0x10e   :  { %v175_v62 = vsub.f32 %v157_v59, %v174_v60  ;;  %v179_v63 = vmul.f32 %v177_v61, %v390_v2  ;;  %v180_v0 = vmul.f32 %v177_v61, %v392_v3  ;;  %v181_v1 = vmul.f32 %v177_v61, %v394_v4 }
 0x10f   :  { %v182_v6 = vmul.f32 %v177_v61, %v400_v8 }
 0x110   :  { %v184_v5 = vperm.slane %v175_v62, 0 }
 0x112   :  { %v186_v7 = vadd.f32 %v184_v5, %v179_v63  ;;  %v187_v9 = vadd.f32 %v184_v5, %v180_v0  ;;  %v188_v10 = vadd.f32 %v184_v5, %v181_v1  ;;  %v189_v11 = vadd.f32 %v184_v5, %v182_v6 }
 0x114   :  { %190 = vst.msk [vmem:[%s452_s3] sm:$0xff] %vm115_vm0, %v186_v7 }
 0x115   :  { %191 = vst.msk [vmem:[%s452_s3 + $0x8] sm:$0xff] %vm115_vm0, %v187_v9 }
 0x116   :  { %192 = vst.msk [vmem:[%s452_s3 + $0x10] sm:$0xff] %vm115_vm0, %v188_v10 }
 0x117   :  { %193 = vst.msk [vmem:[%s452_s3 + $0x18] sm:$0xff] %vm115_vm0, %v189_v11 }
 0x118   :  { %344 = dma.done.wait [#allocation4], 16  }
 0x119   :  { %345 = vsyncadd [#allocation4], 4294967280 }
 0x11a   :  { %346 = dma.done.wait [#allocation9], 16  }
 0x11b   :  { %347 = vsyncadd [#allocation9], 4294967280 }
 0x11c   :  { %231 = vsyncpa [#allocation3], 1 }
 0x11d   :  { %232 = vsyncpa [#allocation6], 1 }
 0x11e   :  { %233 = vsyncpa [#allocation4], 1 }
 0x11f   :  { %234 = vsyncpa [#allocation9], 1 }

</bundles_post_ra>
